<compile_context>
chip_gen: v7x
topology: tpu7x:2x2x1
jax: 0.10.0
libtpu: 0.0.40
codegen_flags: <defaults>
</compile_context>

<pallas_src>
import functools

import jax
import jax.numpy as jnp
from jax.experimental import pallas as pl
from jax.experimental.pallas import tpu as pltpu

ALPHA = 1.0
LANE = 128
PAD_POISON = 3.0e38  # padded-cluster ||c||^2 -> numerator underflows to ~0


def _round_up(n, m):
    return ((n + m - 1) // m) * m


def _cluster_kernel(x_ref, w_ref, b_ref, wc_ref, bc_ref, csq_ref,
                    q_ref, emb_ref, *, alpha):
    x = x_ref[...]                                                      # (TB, IN) bf16

    # Encoder: linear projection to embedding space (MXU, bf16 in / f32 acc).
    emb = jnp.dot(x, w_ref[...],
                  preferred_element_type=jnp.float32) + b_ref[...]      # (TB, D) f32
    emb_ref[...] = emb.astype(emb_ref.dtype)

    # ||e - c||^2 = ||e||^2 - 2 e.c + ||c||^2, with e.c folded through the
    # linear encoder:  e.c = x @ (W @ C^T) + b @ C^T   (second small MXU pass).
    e_sq = jnp.sum(emb * emb, axis=1, keepdims=True)                    # (TB, 1)
    ec = jnp.dot(x, wc_ref[...],
                 preferred_element_type=jnp.float32) + bc_ref[...]      # (TB, Kpad)
    norm_sq = jnp.maximum(e_sq - 2.0 * ec + csq_ref[...], 0.0)          # (TB, Kpad)
    # Padded lanes carry csq = 3e38 -> numerator ~ 0 there; no in-kernel mask.

    # Student's-t kernel. With alpha == 1 the exponent is exactly 1 -> skip pow.
    numerator = pl.reciprocal(1.0 + norm_sq * (1.0 / alpha), approx=True)
    power = (alpha + 1.0) / 2.0
    if power != 1.0:  # static (trace-time) branch; only emitted for alpha != 1
        numerator = jnp.exp(power * jnp.log(numerator))

    # Exact division for the normalization keeps row sums == 1.
    q_ref[...] = (numerator / jnp.sum(numerator, axis=1, keepdims=True)
                  ).astype(q_ref.dtype)


def prepare_cluster_params(w_enc, b_enc, cluster_centers):
    """One-time (per parameter update) layout/precompute step.

    Returns bf16 encoder weights, f32 bias, the centers matmul folded through
    the encoder (Wc, bc), and the lane-padded / poisoned ||c||^2 row.
    """
    in_dim, d = w_enc.shape
    k, d2 = cluster_centers.shape
    assert d == d2, "cluster_centers must live in the encoder embedding space"
    k_pad = _round_up(max(k, 1), LANE)

    c_f32 = cluster_centers.astype(jnp.float32)
    c_t_pad = jnp.zeros((d, k_pad), jnp.float32).at[:, :k].set(c_f32.T)

    w_f32 = w_enc.astype(jnp.float32)
    b_f32 = b_enc.reshape(1, d).astype(jnp.float32)

    w_bf = w_f32.astype(jnp.bfloat16)                               # (IN, D)
    wc_bf = (w_f32 @ c_t_pad).astype(jnp.bfloat16)                  # (IN, Kpad)
    bc_f32 = b_f32 @ c_t_pad                                        # (1, Kpad)
    c_sq = jnp.full((1, k_pad), PAD_POISON, jnp.float32).at[:, :k].set(
        jnp.sum(c_f32 ** 2, axis=1))                                # (1, Kpad)

    return {"w_bf": w_bf, "b_f32": b_f32, "wc_bf": wc_bf, "bc_f32": bc_f32,
            "c_sq": c_sq, "num_clusters": k, "in_dim": in_dim, "d": d,
            "k_pad": k_pad}


def _vmem_limit_bytes(tb, in_dim, d, k_pad, emb_bytes):
    bf16, f32 = 2, 4
    resident = (in_dim * d * bf16 + d * f32 +
                in_dim * k_pad * bf16 + 2 * k_pad * f32)
    tiles = tb * in_dim * bf16 + tb * k_pad * f32 + tb * d * emb_bytes
    # double-buffered pipeline + headroom for compiler temporaries; keep
    # comfortably below the v7x per-TensorCore 64 MiB.
    return min(2 * (resident + tiles) + (8 << 20), 48 << 20)


def cluster_model_forward(x, params, *, tb=512, alpha=ALPHA,
                          emb_dtype=jnp.bfloat16):
    """Forward of Cluster_Model: returns (q: (B, K), emb: (B, D))."""
    B, in_dim = x.shape
    assert in_dim == params["in_dim"]
    D = params["d"]
    K = params["num_clusters"]
    k_pad = params["k_pad"]

    # Batch tile: small batches -> one grid step of round_up(B, 16) rows;
    # large batches -> multiples of 256 rows (full MXU M passes, few DMA
    # descriptors, grid >= 2 so megacore sharding can kick in on v7x).
    b16 = _round_up(max(B, 1), 16)
    if b16 <= max(tb, 16):
        tb = b16
    else:
        tb = _round_up(tb, 256)
    b_pad = _round_up(B, tb)
    if b_pad != B:
        x = jnp.pad(x, ((0, b_pad - B), (0, 0)))
    x_bf = x.astype(jnp.bfloat16)

    kernel = functools.partial(_cluster_kernel, alpha=alpha)
    emb_bytes = jnp.dtype(emb_dtype).itemsize

    q_pad, emb = pl.pallas_call(
        kernel,
        out_shape=(
            jax.ShapeDtypeStruct((b_pad, k_pad), jnp.float32),   # q (lane-padded)
            jax.ShapeDtypeStruct((b_pad, D), emb_dtype),         # embeddings
        ),
        grid=(b_pad // tb,),
        in_specs=[
            pl.BlockSpec((tb, in_dim), lambda i: (i, 0)),        # x tile
            pl.BlockSpec((in_dim, D), lambda i: (0, 0)),         # W (resident)
            pl.BlockSpec((1, D), lambda i: (0, 0)),              # b (resident)
            pl.BlockSpec((in_dim, k_pad), lambda i: (0, 0)),     # W @ C^T (resident)
            pl.BlockSpec((1, k_pad), lambda i: (0, 0)),          # b @ C^T (resident)
            pl.BlockSpec((1, k_pad), lambda i: (0, 0)),          # ||c||^2 (resident)
        ],
        out_specs=(
            pl.BlockSpec((tb, k_pad), lambda i: (i, 0)),
            pl.BlockSpec((tb, D), lambda i: (i, 0)),
        ),
        compiler_params=pltpu.CompilerParams(
            dimension_semantics=("parallel",),
            vmem_limit_bytes=_vmem_limit_bytes(tb, in_dim, D, k_pad, emb_bytes),
        ),
    )(x_bf, params["w_bf"], params["b_f32"], params["wc_bf"],
      params["bc_f32"], params["c_sq"])

    return q_pad[:B, :K], emb[:B]


def _xavier_uniform(key, shape):
    # nn.init.xavier_uniform_ on a 2-D (fan_out, fan_in) tensor.
    fan_out, fan_in = shape
    bound = (6.0 / (fan_in + fan_out)) ** 0.5
    return jax.random.uniform(key, shape, jnp.float32, -bound, bound)


if __name__ == "__main__":
    B = 32         # batch
    IN_DIM = 32    # encoder input feature dim
    D = 768        # embedding_dimension (fixed by the module)
    K = 10         # cluster_number

    key = jax.random.PRNGKey(0)
    k_x, k_w, k_b, k_c = jax.random.split(key, 4)

    x = jax.random.normal(k_x, (B, IN_DIM), jnp.float32)
    w_enc = jax.random.normal(k_w, (IN_DIM, D), jnp.float32) * 0.02
    b_enc = jax.random.normal(k_b, (1, D), jnp.float32) * 0.02
    cluster_centers = _xavier_uniform(k_c, (K, D))

    # Constant prep hoisted out of the per-call path (parameters, not activations).
    params = prepare_cluster_params(w_enc, b_enc, cluster_centers)

    q, emb = cluster_model_forward(x, params)
    jax.block_until_ready((q, emb))

    # Pure-JAX f32 reference of the module's forward.
    emb_ref = x @ w_enc + b_enc
    norm_sq_ref = jnp.sum(
        (emb_ref[:, None, :] - cluster_centers[None, :, :]) ** 2, axis=2)
    num_ref = 1.0 / (1.0 + norm_sq_ref / ALPHA)
    num_ref = num_ref ** ((ALPHA + 1.0) / 2.0)
    q_ref = num_ref / jnp.sum(num_ref, axis=1, keepdims=True)

    assert q.shape == (B, K) and emb.shape == (B, D)
    assert bool(jnp.allclose(jnp.sum(q, axis=1), 1.0, atol=1e-5))
    assert bool(jnp.allclose(emb.astype(jnp.float32), emb_ref,
                             atol=1e-2, rtol=1e-2))
    assert bool(jnp.allclose(q, q_ref, atol=1e-2, rtol=5e-2))

    print("KERNEL_OK")
</pallas_src>

<mosaic_0001>
module attributes {stable_mosaic.version = 11 : i64} {
  func.func @_cluster_kernel(%arg0: i32, %arg1: memref<32x32xbf16, #tpu.memory_space<vmem>>, %arg2: memref<32x768xbf16, #tpu.memory_space<vmem>>, %arg3: memref<1x768xf32, #tpu.memory_space<vmem>>, %arg4: memref<32x128xbf16, #tpu.memory_space<vmem>>, %arg5: memref<1x128xf32, #tpu.memory_space<vmem>>, %arg6: memref<1x128xf32, #tpu.memory_space<vmem>>, %arg7: memref<32x128xf32, #tpu.memory_space<vmem>>, %arg8: memref<32x768xbf16, #tpu.memory_space<vmem>>) attributes {dimension_semantics = [#tpu.dimension_semantics<parallel>], iteration_bounds = array<i64: 1>, scalar_prefetch = 0 : i64, scratch_operands = 0 : i64, tpu.core_type = #tpu.core_type<tc>, window_params = [{transform_indices = @transform_0, window_bounds = array<i64: 32, 32>}, {pipeline_mode = #tpu.pipeline_mode<synchronous>, transform_indices = @transform_1, window_bounds = array<i64: 32, 768>}, {pipeline_mode = #tpu.pipeline_mode<synchronous>, transform_indices = @transform_2, window_bounds = array<i64: 1, 768>}, {pipeline_mode = #tpu.pipeline_mode<synchronous>, transform_indices = @transform_3, window_bounds = array<i64: 32, 128>}, {pipeline_mode = #tpu.pipeline_mode<synchronous>, transform_indices = @transform_4, window_bounds = array<i64: 1, 128>}, {pipeline_mode = #tpu.pipeline_mode<synchronous>, transform_indices = @transform_5, window_bounds = array<i64: 1, 128>}, {transform_indices = @transform_6, window_bounds = array<i64: 32, 128>}, {transform_indices = @transform_7, window_bounds = array<i64: 32, 768>}]} {
    %c0 = arith.constant 0 : index
    %c0_0 = arith.constant 0 : index
    %0 = vector.load %arg1[%c0, %c0_0] : memref<32x32xbf16, #tpu.memory_space<vmem>>, vector<32x32xbf16>
    %c0_1 = arith.constant 0 : index
    %c0_2 = arith.constant 0 : index
    %1 = vector.load %arg2[%c0_1, %c0_2] : memref<32x768xbf16, #tpu.memory_space<vmem>>, vector<32x768xbf16>
    %cst = arith.constant dense<0.000000e+00> : vector<32x768xf32>
    %2 = tpu.matmul %0, %1, %cst {dimension_numbers = #tpu.dot_dimension_numbers<[1], [0], [0], [1], [0, 0, 1, 1], [], []>} : vector<32x32xbf16>, vector<32x768xbf16>, vector<32x768xf32> -> vector<32x768xf32>
    %c0_3 = arith.constant 0 : index
    %c0_4 = arith.constant 0 : index
    %3 = vector.load %arg3[%c0_3, %c0_4] : memref<1x768xf32, #tpu.memory_space<vmem>>, vector<1x768xf32>
    %4 = vector.broadcast %3 : vector<1x768xf32> to vector<32x768xf32>
    %5 = arith.addf %2, %4 : vector<32x768xf32>
    %6 = arith.truncf %5 : vector<32x768xf32> to vector<32x768xbf16>
    %c0_5 = arith.constant 0 : index
    %c0_6 = arith.constant 0 : index
    %7 = vector.load %arg8[%c0_5, %c0_6] : memref<32x768xbf16, #tpu.memory_space<vmem>>, vector<32x768xbf16>
    tpu.vector_store %arg8[%c0_5, %c0_6], %6 {strides = array<i32>} : memref<32x768xbf16, #tpu.memory_space<vmem>>, vector<32x768xbf16>,
    %8 = arith.mulf %5, %5 : vector<32x768xf32>
    %cst_7 = arith.constant dense<0.000000e+00> : vector<32xf32>
    %9 = vector.multi_reduction <add>, %8, %cst_7 [1] : vector<32x768xf32> to vector<32xf32>
    %10 = vector.shape_cast %9 : vector<32xf32> to vector<32x1xf32>
    %c0_8 = arith.constant 0 : index
    %c0_9 = arith.constant 0 : index
    %11 = vector.load %arg4[%c0_8, %c0_9] : memref<32x128xbf16, #tpu.memory_space<vmem>>, vector<32x128xbf16>
    %cst_10 = arith.constant dense<0.000000e+00> : vector<32x128xf32>
    %12 = tpu.matmul %0, %11, %cst_10 {dimension_numbers = #tpu.dot_dimension_numbers<[1], [0], [0], [1], [0, 0, 1, 1], [], []>} : vector<32x32xbf16>, vector<32x128xbf16>, vector<32x128xf32> -> vector<32x128xf32>
    %c0_11 = arith.constant 0 : index
    %c0_12 = arith.constant 0 : index
    %13 = vector.load %arg5[%c0_11, %c0_12] : memref<1x128xf32, #tpu.memory_space<vmem>>, vector<1x128xf32>
    %14 = vector.broadcast %13 : vector<1x128xf32> to vector<32x128xf32>
    %15 = arith.addf %12, %14 : vector<32x128xf32>
    %cst_13 = arith.constant 2.000000e+00 : f32
    %16 = vector.broadcast %cst_13 : f32 to vector<32x128xf32>
    %17 = arith.mulf %16, %15 : vector<32x128xf32>
    %18 = vector.broadcast %10 : vector<32x1xf32> to vector<32x128xf32>
    %19 = arith.subf %18, %17 : vector<32x128xf32>
    %c0_14 = arith.constant 0 : index
    %c0_15 = arith.constant 0 : index
    %20 = vector.load %arg6[%c0_14, %c0_15] : memref<1x128xf32, #tpu.memory_space<vmem>>, vector<1x128xf32>
    %21 = vector.broadcast %20 : vector<1x128xf32> to vector<32x128xf32>
    %22 = arith.addf %19, %21 : vector<32x128xf32>
    %cst_16 = arith.constant 0.000000e+00 : f32
    %23 = vector.broadcast %cst_16 : f32 to vector<32x128xf32>
    %24 = arith.maximumf %22, %23 : vector<32x128xf32>
    %cst_17 = arith.constant 1.000000e+00 : f32
    %25 = vector.broadcast %cst_17 : f32 to vector<32x128xf32>
    %26 = arith.mulf %24, %25 : vector<32x128xf32>
    %cst_18 = arith.constant 1.000000e+00 : f32
    %27 = vector.broadcast %cst_18 : f32 to vector<32x128xf32>
    %28 = arith.addf %27, %26 : vector<32x128xf32>
    %29 = tpu.reciprocal %28 {approx = true} : vector<32x128xf32> -> vector<32x128xf32>
    %cst_19 = arith.constant dense<0.000000e+00> : vector<32xf32>
    %30 = vector.multi_reduction <add>, %29, %cst_19 [1] : vector<32x128xf32> to vector<32xf32>
    %31 = vector.shape_cast %30 : vector<32xf32> to vector<32x1xf32>
    %32 = vector.broadcast %31 : vector<32x1xf32> to vector<32x128xf32>
    %33 = arith.divf %29, %32 : vector<32x128xf32>
    %c0_20 = arith.constant 0 : index
    %c0_21 = arith.constant 0 : index
    %34 = vector.load %arg7[%c0_20, %c0_21] : memref<32x128xf32, #tpu.memory_space<vmem>>, vector<32x128xf32>
    tpu.vector_store %arg7[%c0_20, %c0_21], %33 {strides = array<i32>} : memref<32x128xf32, #tpu.memory_space<vmem>>, vector<32x128xf32>,
    return
  }
  func.func @transform_0(%arg0: i32) -> (i32, i32) {
    %c0_i32 = arith.constant 0 : i32
    %c0_i32_0 = arith.constant 0 : i32
    return %arg0, %c0_i32 : i32, i32
  }
  func.func @transform_1(%arg0: i32) -> (i32, i32) {
    %c0_i32 = arith.constant 0 : i32
    %c0_i32_0 = arith.constant 0 : i32
    %c0_i32_1 = arith.constant 0 : i32
    return %c0_i32, %c0_i32_0 : i32, i32
  }
  func.func @transform_2(%arg0: i32) -> (i32, i32) {
    %c0_i32 = arith.constant 0 : i32
    %c0_i32_0 = arith.constant 0 : i32
    %c0_i32_1 = arith.constant 0 : i32
    return %c0_i32, %c0_i32_0 : i32, i32
  }
  func.func @transform_3(%arg0: i32) -> (i32, i32) {
    %c0_i32 = arith.constant 0 : i32
    %c0_i32_0 = arith.constant 0 : i32
    %c0_i32_1 = arith.constant 0 : i32
    return %c0_i32, %c0_i32_0 : i32, i32
  }
  func.func @transform_4(%arg0: i32) -> (i32, i32) {
    %c0_i32 = arith.constant 0 : i32
    %c0_i32_0 = arith.constant 0 : i32
    %c0_i32_1 = arith.constant 0 : i32
    return %c0_i32, %c0_i32_0 : i32, i32
  }
  func.func @transform_5(%arg0: i32) -> (i32, i32) {
    %c0_i32 = arith.constant 0 : i32
    %c0_i32_0 = arith.constant 0 : i32
    %c0_i32_1 = arith.constant 0 : i32
    return %c0_i32, %c0_i32_0 : i32, i32
  }
  func.func @transform_6(%arg0: i32) -> (i32, i32) {
    %c0_i32 = arith.constant 0 : i32
    %c0_i32_0 = arith.constant 0 : i32
    return %arg0, %c0_i32 : i32, i32
  }
  func.func @transform_7(%arg0: i32) -> (i32, i32) {
    %c0_i32 = arith.constant 0 : i32
    %c0_i32_0 = arith.constant 0 : i32
    return %arg0, %c0_i32 : i32, i32
  }
}

</mosaic_0001>

<bundles_post_ra>
// kernel: tpu_custom_call.1
= control target key start
LH: loop header
LB: loop body
LE: loop exit
PB: predicated region body
PF: predicated region fallthrough
CT: control target
= control target key end

     0   :  { %13 = vsyncpa [#allocation3], 0  ;;  %s1029_s0 = inlined_call_operand.hbm [shape: bf16[32,32], index: 0, kind: input, shape index: {}]   ;;  %s1030_s1 = inlined_call_operand.hbm [shape: bf16[32,768], index: 1, kind: input, shape index: {}]   ;;  %s1031_s2 = inlined_call_operand.vmem [shape: f32[1,768], index: 2, kind: input, shape index: {}]   ;;  %s1032_s3 = inlined_call_operand.hbm [shape: bf16[32,128], index: 3, kind: input, shape index: {}]   ;;  %s1033_s4 = inlined_call_operand.vmem [shape: f32[1,128], index: 4, kind: input, shape index: {}]   ;;  %s1034_s5 = inlined_call_operand.vmem [shape: f32[1,128], index: 5, kind: input, shape index: {}]   ;;  %s1035_s6 = inlined_call_operand.hbm [shape: f32[32,128], index: 6, kind: output, shape index: {0}]   ;;  %s1036_s7 = inlined_call_operand.hbm [shape: bf16[32,768], index: 7, kind: output, shape index: {1}]  }
   0x1   :  { %14 = vsyncpa [#allocation6], 0 }
   0x2   :  { %15 = vsyncpa [#allocation4], 0 }
   0x3   :  { %16 = vsyncpa [#allocation10], 0  ;;  %s876_s24 = smov [#allocation5]   ;;  %s758_s28 = scalar_lea.hbm %s1030_s1, 1536 }
   0x4   :  { %s34_s25 = sshll.u32 %s876_s24, 4  ;;  %p759_p0 = scmp.ne.s32.totalorder %s1030_s1, %s758_s28  ;;  %s35_s25 = int_to_ptr.vmem [resolvable:$true] %s34_s25 }
   0x5   :  { %p762_p1 = scmp.lt.u32.totalorder %s758_s28, %s1030_s1 }
   0x7   :  { %p764_p2 = pnand %p762_p1, %p759_p0 }
   0x9   :  { %767 = shalt.err (!%p764_p2)
}
   0xa   :  { %s768_s10 = scalar_lea.vmem %s35_s25, 1536  ;;  %p773_p4 = scmp.lt.s32.totalorder %s35_s25, %s35_s25 }
   0xb   :  { %p769_p3 = scmp.ne.s32.totalorder %s35_s25, %s768_s10  ;;  %p774_p5 = scmp.lt.s32.totalorder %s768_s10, %s768_s10 }
   0xd   :  { %p775_p6 = por %p774_p5, %p773_p4 }
   0xf   :  { %p776_p7 = pnand %p775_p6, %p769_p3 }
  0x11   :  { %779 = shalt.err (!%p776_p7)
}
  0x12   :  { %s877_s11 = smov 384   ;;  %s878_s12 = smov 24  }
  0x13   :  { %40 = dma.hbm_to_vmem [thread:$0]  %s1030_s1, 1536, %s35_s25, [#allocation6], %s877_s11, %s877_s11, %s878_s12  }
  0x14   :  { %s879_s15 = smov [#allocation2]   ;;  %s780_s19 = scalar_lea.hbm %s1029_s0, 256 }
  0x15   :  { %s22_s16 = sshll.u32 %s879_s15, 4  ;;  %p781_p8 = scmp.ne.s32.totalorder %s1029_s0, %s780_s19  ;;  %s23_s16 = int_to_ptr.vmem [resolvable:$true] %s22_s16 }
  0x16   :  { %p784_p9 = scmp.lt.u32.totalorder %s780_s19, %s1029_s0 }
  0x18   :  { %p786_p10 = pnand %p784_p9, %p781_p8 }
  0x1a   :  { %789 = shalt.err (!%p786_p10)
}
  0x1b   :  { %s790_s24 = scalar_lea.vmem %s23_s16, 256  ;;  %p795_p12 = scmp.lt.s32.totalorder %s23_s16, %s23_s16 }
  0x1c   :  { %p791_p11 = scmp.ne.s32.totalorder %s23_s16, %s790_s24  ;;  %p796_p13 = scmp.lt.s32.totalorder %s790_s24, %s790_s24 }
  0x1e   :  { %p797_p0 = por %p796_p13, %p795_p12 }
  0x20   :  { %p798_p1 = pnand %p797_p0, %p791_p11 }
  0x22   :  { %801 = shalt.err (!%p798_p1)
}
  0x23   :  { %s880_s1 = smov 64   ;;  %s881_s25 = smov 4  }
  0x24   :  { %28 = dma.hbm_to_vmem [thread:$0]  %s1029_s0, 256, %s23_s16, [#allocation3], %s880_s1, %s880_s1, %s881_s25  }
  0x25   :  { %s882_s28 = smov [#allocation7]   ;;  %s802_s9 = scalar_lea.hbm %s1032_s3, 256 }
  0x26   :  { %s48_s29 = sshll.u32 %s882_s28, 4  ;;  %p803_p2 = scmp.ne.s32.totalorder %s1032_s3, %s802_s9  ;;  %s49_s29 = int_to_ptr.vmem [resolvable:$true] %s48_s29 }
  0x27   :  { %p806_p3 = scmp.lt.u32.totalorder %s802_s9, %s1032_s3 }
  0x29   :  { %p808_p4 = pnand %p806_p3, %p803_p2 }
  0x2b   :  { %811 = shalt.err (!%p808_p4)
}
  0x2c   :  { %s812_s17 = scalar_lea.vmem %s49_s29, 256  ;;  %p817_p6 = scmp.lt.s32.totalorder %s49_s29, %s49_s29 }
  0x2d   :  { %p813_p5 = scmp.ne.s32.totalorder %s49_s29, %s812_s17  ;;  %p818_p7 = scmp.lt.s32.totalorder %s812_s17, %s812_s17 }
  0x2f   :  { %p819_p8 = por %p818_p7, %p817_p6 }
  0x31   :  { %p820_p9 = pnand %p819_p8, %p813_p5 }
  0x33   :  { %823 = shalt.err (!%p820_p9)
}
  0x34   :  { %54 = dma.hbm_to_vmem [thread:$0]  %s1032_s3, 256, %s49_s29, [#allocation6], %s880_s1, %s880_s1, %s881_s25  }
  0x35   :  { %868 = dma.done.wait [#allocation3], 256  }
  0x36   :  { %869 = vsyncadd [#allocation3], 4294967040 }
  0x37   :  { %870 = dma.done.wait [#allocation6], 1792  }
  0x38   :  { %871 = vsyncadd [#allocation6], 4294965504  ;;  %v883_v0 = vmov 0   ;;  %v720_v1 = vld [vmem:[#allocation5 + $0x4] ss:$24 sps:$4 sm:$0xff]   ;;  %v731_v8 = vld [vmem:[#allocation2] sm:$0xff]   ;;  %v87_v17 = vlaneseq }
  0x39   :  { %226 = vmatprep.mubr.bf16.mxu0 %v883_v0  ;;  %279 = vmatprep.mubr.bf16.mxu1 %v883_v0  ;;  %v722_v2 = vld [vmem:[#allocation5] ss:$24 sps:$4 sm:$0xff]   ;;  %v723_v3 = vld [vmem:[#allocation5 + $0xc] ss:$24 sps:$4 sm:$0xff]   ;;  %v728_v6 = vld [vmem:[#allocation5 + $0x30] ss:$24 sps:$4 sm:$0xff]  }
  0x3a   :  { %194 = vmatprep.subr.bf16.mxu0 %v720_v1  ;;  %v725_v4 = vld [vmem:[#allocation5 + $0x34] ss:$24 sps:$4 sm:$0xff]   ;;  %v727_v5 = vld [vmem:[#allocation5 + $0x8] ss:$24 sps:$4 sm:$0xff]   ;;  %247 = vmatprep.subr.bf16.mxu1 %v723_v3  ;;  %vm187_vm0 = vcmask 261120   ;;  %v736_v16 = vld [vmem:[#allocation2 + $0x8] sm:$0xff]  }
  0x3b   :  { %195 = vmatpush1.bf16.msra.mxu0 %v722_v2  ;;  %v729_v7 = vld [vmem:[#allocation5 + $0x3c] ss:$24 sps:$4 sm:$0xff]   ;;  %248 = vmatpush1.bf16.msra.mxu1 %v727_v5  ;;  %v732_v9 = vld [vmem:[#allocation5 + $0x38] ss:$24 sps:$4 sm:$0xff]   ;;  %v740_v14 = vld [vmem:[#allocation7] sm:$0xff]   ;;  %v88_v18 = vshrl.u32 %v87_v17, 7 }
  0x3c   :  { %196 = vmatprep.subr.bf16.mxu0 %v725_v4  ;;  %249 = vmatprep.subr.bf16.mxu1 %v729_v7  ;;  %v733_v10 = vld [vmem:[#allocation5 + $0x10] ss:$24 sps:$4 sm:$0xff]   ;;  %v735_v11 = vld [vmem:[#allocation5 + $0x14] ss:$24 sps:$4 sm:$0xff]   ;;  %v737_v12 = vld [vmem:[#allocation5 + $0x40] ss:$24 sps:$4 sm:$0xff]  }
  0x3d   :  { %v739_v13 = vld [vmem:[#allocation5 + $0x44] ss:$24 sps:$4 sm:$0xff]   ;;  %v741_v15 = vld [vmem:[#allocation7 + $0x8] sm:$0xff]   ;;  %v89_v19 = vsub.s32 0, %v88_v18  ;;  %v85_v20 = vld [vmem:[%s1031_s2] sm:$0x3f] }
  0x3e   :  { %v93_v21 = vsub.s32 1, %v88_v18  ;;  %v97_v22 = vsub.s32 2, %v88_v18  ;;  %v101_v23 = vsub.s32 3, %v88_v18  ;;  %v105_v48 = vsub.s32 4, %v88_v18 }
  0x3f   :  { %197 = vmatpush1.bf16.msra.mxu0 %v728_v6  ;;  %250 = vmatpush1.bf16.msra.mxu1 %v732_v9  ;;  %v90_v24 = vrot.slane %v85_v20, %v89_v19  ;;  %v109_v56 = vsub.s32 5, %v88_v18 }
  0x40   :  { %300 = vmatprep.subr.bf16.mxu0 %v735_v11  ;;  %700 = vmatprep.subr.bf16.mxu1 %v740_v14  ;;  %v94_v25 = vrot.slane %v85_v20, %v93_v21  ;;  %v98_v26 = vrot.slane %v85_v20, %v97_v22  ;;  %v978_v28 = vrot.slane %v85_v20, %v101_v23 }
  0x41   :  { %v982_v4 = vrot.slane %v85_v20, %v105_v48  ;;  %v984_v11 = vrot.slane %v85_v20, %v109_v56 }
  0x42   :  { %660 = vmatmul.mubr.msk.bf16.vlgmr.msra.gmra.mrb[0].mxu0 %vm187_vm0, %v731_v8  ;;  %662 = vmatmul.mubr.msk.bf16.vlgmr.msra.gmra.mrb[0].mxu1 %vm187_vm0, %v731_v8 }
  0x43   :  { %301 = vmatpush1.bf16.msra.mxu0 %v733_v10  ;;  %236 = vmatprep.mubr.bf16.mxu0 %v883_v0 }
  0x44   :  { %302 = vmatprep.subr.bf16.mxu0 %v739_v13  ;;  %289 = vmatprep.mubr.bf16.mxu1 %v883_v0 }
  0x45   :  { %701 = vmatpush3.bf16.msra.mxu1 %v740_v14 }
  0x46   :  { %702 = vmatprep.subr.bf16.mxu1 %v741_v15 }
  0x47   :  { %303 = vmatpush1.bf16.msra.mxu0 %v737_v12 }
  0x49   :  { %703 = vmatpush3.bf16.msra.mxu1 %v741_v15 }
  0x4a   :  { %661 = vmatmul.mubr.msk.bf16.gmra.mrb[4].mxu0 %vm187_vm0, %v736_v16  ;;  %663 = vmatmul.mubr.msk.bf16.gmra.mrb[4].mxu1 %vm187_vm0, %v736_v16 }
  0x4b   :  { %332 = vmatprep.mubr.bf16.mxu0 %v883_v0  ;;  %704 = vmatprep.mubr.msk.bf16.mxu1 %vm187_vm0, %v731_v8 }
  0x52   :  { %664 = vmatmul.mubr.msk.bf16.vlgmr.msra.gmra.mrb[8].mxu0 %vm187_vm0, %v731_v8  ;;  %705 = vmatmul.mubr.msk.bf16.vlgmr.msra.gmra.mrb[8].mxu1 %vm187_vm0, %v736_v16 }
  0x53   :  { %342 = vmatprep.mubr.bf16.mxu0 %v883_v0 }
  0x5a   :  { %665 = vmatmul.mubr.msk.bf16.gmra.mrb[12].mxu0 %vm187_vm0, %v736_v16 }
 0x115   :  { %v228_v27 = vpop.f32.mrb[0].mxu0  ;;  %v281_v33 = vpop.f32.mrb[0].mxu1 }
 0x116   :  { %v229_v29 = vadd.f32 %v228_v27, %v90_v24  ;;  %v230_v30 = vpop.f32.mrb[1].mxu0  ;;  %v282_v37 = vadd.f32 %v281_v33, %v98_v26  ;;  %v283_v38 = vpop.f32.mrb[1].mxu1 }
 0x117   :  { %v231_v31 = vadd.f32 %v230_v30, %v94_v25  ;;  %v232_v32 = vpop.f32.mrb[2].mxu0  ;;  %v284_v42 = vadd.f32 %v283_v38, %v978_v28  ;;  %v285_v43 = vpop.f32.mrb[2].mxu1 }
 0x118   :  { %v437_v34 = vmul.f32 %v229_v29, %v229_v29  ;;  %v233_v35 = vadd.f32 %v232_v32, %v90_v24  ;;  %v234_v36 = vpop.f32.mrb[3].mxu0  ;;  %v439_v45 = vmul.f32 %v282_v37, %v282_v37  ;;  %v286_v46 = vadd.f32 %v285_v43, %v98_v26  ;;  %v287_v47 = vpop.f32.mrb[3].mxu1 }
 0x119   :  { %v684_v39 = vpack.c.bf16 %v231_v31, %v229_v29  ;;  %v438_v40 = vmul.f32 %v231_v31, %v231_v31  ;;  %v235_v41 = vadd.f32 %v234_v36, %v94_v25  ;;  %v685_v52 = vpack.c.bf16 %v284_v42, %v282_v37 }
 0x11a   :  { %v443_v44 = vmul.f32 %v233_v35, %v233_v35  ;;  %v440_v53 = vmul.f32 %v284_v42, %v284_v42  ;;  %v445_v54 = vmul.f32 %v286_v46, %v286_v46  ;;  %v288_v55 = vadd.f32 %v287_v47, %v978_v28 }
 0x11b   :  { %425 = vst [vmem:[#allocation9] sm:$0xff] %v684_v39  ;;  %v461_v49 = vadd.f32 %v438_v40, %v437_v34  ;;  %v687_v50 = vpack.c.bf16 %v235_v41, %v233_v35  ;;  %v444_v51 = vmul.f32 %v235_v41, %v235_v41  ;;  %426 = vst [vmem:[#allocation9 + $0x8] sm:$0xff] %v685_v52 }
 0x11c   :  { %v688_v60 = vpack.c.bf16 %v288_v55, %v286_v46  ;;  %v446_v61 = vmul.f32 %v288_v55, %v288_v55 }
 0x11d   :  { %428 = vst [vmem:[#allocation9 + $0x18] sm:$0xff] %v687_v50  ;;  %v468_v57 = vadd.f32 %v444_v51, %v443_v44  ;;  %v462_v58 = vadd.f32 %v461_v49, %v439_v45  ;;  %v238_v59 = vpop.f32.mrb[4].mxu0  ;;  %v291_v3 = vpop.f32.mrb[4].mxu1 }
 0x11e   :  { %v239_v62 = vadd.f32 %v238_v59, %v90_v24  ;;  %v240_v63 = vpop.f32.mrb[5].mxu0  ;;  %429 = vst [vmem:[#allocation9 + $0x20] sm:$0xff] %v688_v60  ;;  %v292_v9 = vadd.f32 %v291_v3, %v98_v26  ;;  %v293_v10 = vpop.f32.mrb[5].mxu1 }
 0x11f   :  { %v469_v0 = vadd.f32 %v468_v57, %v445_v54  ;;  %v241_v1 = vadd.f32 %v240_v63, %v94_v25  ;;  %v242_v2 = vpop.f32.mrb[6].mxu0  ;;  %v463_v5 = vadd.f32 %v462_v58, %v440_v53  ;;  %v295_v16 = vpop.f32.mrb[6].mxu1  ;;  %v294_v19 = vadd.f32 %v293_v10, %v978_v28 }
 0x120   :  { %v449_v6 = vmul.f32 %v239_v62, %v239_v62  ;;  %v243_v7 = vadd.f32 %v242_v2, %v90_v24  ;;  %v244_v8 = vpop.f32.mrb[7].mxu0  ;;  %v451_v18 = vmul.f32 %v292_v9, %v292_v9  ;;  %v296_v21 = vadd.f32 %v295_v16, %v98_v26  ;;  %v297_v22 = vpop.f32.mrb[7].mxu1  ;;  %v683_v16 = vld [vmem:[%s1034_s5] ss:$0 sm:$0xff] }
 0x121   :  { %v470_v12 = vadd.f32 %v469_v0, %v446_v61  ;;  %v690_v13 = vpack.c.bf16 %v241_v1, %v239_v62  ;;  %v450_v14 = vmul.f32 %v241_v1, %v241_v1  ;;  %v245_v15 = vadd.f32 %v244_v8, %v94_v25 }
 0x122   :  { %v455_v17 = vmul.f32 %v243_v7, %v243_v7  ;;  %v298_v29 = vadd.f32 %v297_v22, %v978_v28  ;;  %v691_v30 = vpack.c.bf16 %v294_v19, %v292_v9  ;;  %v452_v20 = vmul.f32 %v294_v19, %v294_v19 }
 0x123   :  { %431 = vst [vmem:[#allocation9 + $0x30] sm:$0xff] %v690_v13  ;;  %v475_v23 = vadd.f32 %v450_v14, %v449_v6  ;;  %v693_v27 = vpack.c.bf16 %v245_v15, %v243_v7  ;;  %v456_v24 = vmul.f32 %v245_v15, %v245_v15  ;;  %v457_v31 = vmul.f32 %v296_v21, %v296_v21 }
 0x124   :  { %v694_v25 = vpack.c.bf16 %v298_v29, %v296_v21  ;;  %v458_v34 = vmul.f32 %v298_v29, %v298_v29  ;;  %432 = vst [vmem:[#allocation9 + $0x38] sm:$0xff] %v691_v30 }
 0x125   :  { %434 = vst [vmem:[#allocation9 + $0x48] sm:$0xff] %v693_v27  ;;  %v482_v32 = vadd.f32 %v456_v24, %v455_v17  ;;  %v476_v33 = vadd.f32 %v475_v23, %v451_v18  ;;  %v334_v35 = vpop.f32.mrb[8].mxu0  ;;  %v706_v28 = vpop.f32.mrb[8].mxu1 }
 0x126   :  { %v335_v36 = vadd.f32 %v334_v35, %v982_v4  ;;  %v336_v26 = vpop.f32.mrb[9].mxu0  ;;  %435 = vst [vmem:[#allocation9 + $0x50] sm:$0xff] %v694_v25  ;;  %v546_v44 = vpop.f32.mrb[9].mxu1 }
 0x127   :  { %v483_v37 = vadd.f32 %v482_v32, %v457_v31  ;;  %v337_v38 = vadd.f32 %v336_v26, %v984_v11  ;;  %v338_v39 = vpop.f32.mrb[10].mxu0  ;;  %v477_v40 = vadd.f32 %v476_v33, %v452_v20  ;;  %v707_v49 = vpop.f32.mrb[10].mxu1 }
 0x128   :  { %v441_v41 = vmul.f32 %v335_v36, %v335_v36  ;;  %v339_v42 = vadd.f32 %v338_v39, %v982_v4  ;;  %v340_v43 = vpop.f32.mrb[11].mxu0  ;;  %v549_v52 = vpop.f32.mrb[11].mxu1 }
 0x129   :  { %v484_v45 = vadd.f32 %v483_v37, %v458_v34  ;;  %v686_v46 = vpack.c.bf16 %v337_v38, %v335_v36  ;;  %v341_v47 = vadd.f32 %v340_v43, %v984_v11  ;;  %v442_v48 = vmul.f32 %v337_v38, %v337_v38 }
 0x12a   :  { %v447_v50 = vmul.f32 %v339_v42, %v339_v42  ;;  %v464_v51 = vadd.f32 %v463_v5, %v441_v41 }
 0x12b   :  { %427 = vst [vmem:[#allocation9 + $0x10] sm:$0xff] %v686_v46  ;;  %v689_v53 = vpack.c.bf16 %v341_v47, %v339_v42  ;;  %v448_v54 = vmul.f32 %v341_v47, %v341_v47 }
 0x12c   :  { %v465_v55 = vadd.f32 %v464_v51, %v442_v48  ;;  %v471_v56 = vadd.f32 %v470_v12, %v447_v50 }
 0x12d   :  { %430 = vst [vmem:[#allocation9 + $0x28] sm:$0xff] %v689_v53  ;;  %v344_v57 = vpop.f32.mrb[12].mxu0 }
 0x12e   :  { %v345_v58 = vadd.f32 %v344_v57, %v982_v4  ;;  %v346_v59 = vpop.f32.mrb[13].mxu0  ;;  %466 = vadd.xlane.f32.xlu0 %v465_v55  ;;  %v472_v60 = vadd.f32 %v471_v56, %v448_v54 }
 0x12f   :  { %v347_v61 = vadd.f32 %v346_v59, %v984_v11  ;;  %v348_v62 = vpop.f32.mrb[14].mxu0 }
 0x130   :  { %v453_v63 = vmul.f32 %v345_v58, %v345_v58  ;;  %v349_v0 = vadd.f32 %v348_v62, %v982_v4  ;;  %v350_v1 = vpop.f32.mrb[15].mxu0  ;;  %v678_v4 = vld [vmem:[%s1033_s4] ss:$0 sm:$0xff]  ;;  %s884_s4 = smov [#allocation9]  }
 0x131   :  { %v692_v2 = vpack.c.bf16 %v347_v61, %v345_v58  ;;  %v351_v3 = vadd.f32 %v350_v1, %v984_v11  ;;  %v454_v5 = vmul.f32 %v347_v61, %v347_v61  ;;  %v547_v14 = vadd.f32 %v678_v4, %v546_v44  ;;  %s629_s5 = sshll.u32 %s884_s4, 4  ;;  %s630_s5 = int_to_ptr.vmem [resolvable:$true] %s629_s5 }
 0x132   :  { %v459_v6 = vmul.f32 %v349_v0, %v349_v0  ;;  %473 = vadd.xlane.f32.xlu0 %v472_v60  ;;  %v478_v7 = vadd.f32 %v477_v40, %v453_v63  ;;  %v550_v11 = vadd.f32 %v678_v4, %v549_v52  ;;  %v555_v21 = vadd.f32 %v706_v28, %v678_v4  ;;  %s824_s22 = scalar_lea.vmem %s630_s5, 1536  ;;  %p829_p11 = scmp.lt.s32.totalorder %s630_s5, %s630_s5 }
 0x133   :  { %433 = vst [vmem:[#allocation9 + $0x40] sm:$0xff] %v692_v2  ;;  %v695_v8 = vpack.c.bf16 %v351_v3, %v349_v0  ;;  %v460_v9 = vmul.f32 %v351_v3, %v351_v3  ;;  %v561_v15 = vmul.f32 2.0, %v547_v14  ;;  %v558_v30 = vadd.f32 %v707_v49, %v678_v4  ;;  %p825_p10 = scmp.ne.s32.totalorder %s630_s5, %s824_s22  ;;  %p830_p12 = scmp.lt.s32.totalorder %s824_s22, %s824_s22 }
 0x134   :  { %v479_v10 = vadd.f32 %v478_v7, %v454_v5  ;;  %v485_v12 = vadd.f32 %v484_v45, %v459_v6  ;;  %v562_v18 = vmul.f32 2.0, %v550_v11  ;;  %v563_v29 = vmul.f32 2.0, %v555_v21 }
 0x135   :  { %436 = vst [vmem:[#allocation9 + $0x58] sm:$0xff] %v695_v8  ;;  %v564_v34 = vmul.f32 2.0, %v558_v30  ;;  %p831_p13 = por %p830_p12, %p829_p11 }
 0x136   :  { %480 = vadd.xlane.f32.xlu1 %v479_v10  ;;  %v486_v13 = vadd.f32 %v485_v12, %v460_v9 }
 0x137   :  { %p832_p0 = pnand %p831_p13, %p825_p10 }
 0x13a   :  { %487 = vadd.xlane.f32.xlu1 %v486_v13 }
 0x1bb   :  { %v467_v17 = vpop.xlane.xlu0 %466 }
 0x1bc   :  { %v565_v19 = vsub.f32 %v467_v17, %v561_v15 }
 0x1be   :  { %v576_v22 = vadd.f32 %v683_v16, %v565_v19 }
 0x1bf   :  { %v474_v23 = vpop.xlane.xlu0 %473 }
 0x1c0   :  { %v580_v27 = vmax.f32 %v576_v22, 0.0  ;;  %v566_v24 = vsub.f32 %v474_v23, %v562_v18 }
 0x1c2   :  { %v584_v20 = vadd.f32 1.0, %v580_v27  ;;  %v577_v31 = vadd.f32 %v683_v16, %v566_v24 }
 0x1c3   :  { %v481_v32 = vpop.xlane.xlu1 %480 }
 0x1c4   :  { %742 = vrcp.f32 %v584_v20  ;;  %v581_v33 = vmax.f32 %v577_v31, 0.0  ;;  %v567_v25 = vsub.f32 %v481_v32, %v563_v29 }
 0x1c6   :  { %v585_v35 = vadd.f32 1.0, %v581_v33  ;;  %v578_v36 = vadd.f32 %v683_v16, %v567_v25 }
 0x1c7   :  { %v488_v26 = vpop.xlane.xlu1 %487 }
 0x1c8   :  { %744 = vrcp.f32 %v585_v35  ;;  %v582_v37 = vmax.f32 %v578_v36, 0.0  ;;  %v568_v38 = vsub.f32 %v488_v26, %v564_v34 }
 0x1ca   :  { %v586_v39 = vadd.f32 1.0, %v582_v37  ;;  %v579_v40 = vadd.f32 %v683_v16, %v568_v38 }
 0x1cc   :  { %746 = vrcp.f32 %v586_v39  ;;  %v583_v28 = vmax.f32 %v579_v40, 0.0 }
 0x1ce   :  { %v743_v41 = vpop.eup %742  ;;  %v587_v42 = vadd.f32 1.0, %v583_v28 }
 0x1cf   :  { %592 = vadd.xlane.f32.xlu0 %v743_v41 }
 0x1d0   :  { %748 = vrcp.f32 %v587_v42 }
 0x1d2   :  { %v745_v43 = vpop.eup %744 }
 0x1d3   :  { %594 = vadd.xlane.f32.xlu1 %v745_v43 }
 0x1d6   :  { %v747_v44 = vpop.eup %746 }
 0x1d7   :  { %596 = vadd.xlane.f32.xlu0 %v747_v44 }
 0x1da   :  { %v749_v45 = vpop.eup %748 }
 0x1db   :  { %598 = vadd.xlane.f32.xlu1 %v749_v45 }
 0x1dc   :  { %835 = shalt.err (!%p832_p0)
}
 0x1dd   :  { %s836_s1 = scalar_lea.hbm %s1036_s7, 1536 }
 0x1de   :  { %p837_p1 = scmp.ne.s32.totalorder %s1036_s7, %s836_s1  ;;  %p840_p2 = scmp.lt.u32.totalorder %s836_s1, %s1036_s7 }
 0x1e0   :  { %p842_p3 = pnand %p840_p2, %p837_p1 }
 0x1e2   :  { %845 = shalt.err (!%p842_p3)
}
 0x1e3   :  { %635 = dma.vmem_to_hbm [thread:$0]  %s630_s5, 1536, %s1036_s7, [#allocation10], %s877_s11, %s877_s11, %s878_s12  }
 0x1e4   :  { %s885_s8 = smov [#allocation8]  }
 0x1e5   :  { %s617_s9 = sshll.u32 %s885_s8, 4  ;;  %s618_s9 = int_to_ptr.vmem [resolvable:$true] %s617_s9 }
 0x1e6   :  { %s846_s7 = scalar_lea.vmem %s618_s9, 512  ;;  %p851_p5 = scmp.lt.s32.totalorder %s618_s9, %s618_s9 }
 0x1e7   :  { %p847_p4 = scmp.ne.s32.totalorder %s618_s9, %s846_s7  ;;  %p852_p6 = scmp.lt.s32.totalorder %s846_s7, %s846_s7 }
 0x1e9   :  { %p853_p7 = por %p852_p6, %p851_p5 }
 0x1eb   :  { %p854_p8 = pnand %p853_p7, %p847_p4 }
 0x25c   :  { %v593_v46 = vpop.xlane.xlu0 %592 }
 0x25d   :  { %750 = vrcp.f32 %v593_v46 }
 0x260   :  { %v595_v47 = vpop.xlane.xlu1 %594 }
 0x261   :  { %752 = vrcp.f32 %v595_v47 }
 0x264   :  { %v597_v48 = vpop.xlane.xlu0 %596 }
 0x265   :  { %754 = vrcp.f32 %v597_v48 }
 0x267   :  { %v751_v49 = vpop.eup %750 }
 0x268   :  { %v601_v50 = vmul.f32 %v751_v49, %v743_v41  ;;  %v599_v51 = vpop.xlane.xlu1 %598 }
 0x269   :  { %756 = vrcp.f32 %v599_v51 }
 0x26a   :  { %608 = vst [vmem:[#allocation8] sm:$0xff] %v601_v50 }
 0x26b   :  { %v753_v52 = vpop.eup %752 }
 0x26c   :  { %v603_v53 = vmul.f32 %v753_v52, %v745_v43 }
 0x26e   :  { %609 = vst [vmem:[#allocation8 + $0x8] sm:$0xff] %v603_v53 }
 0x26f   :  { %v755_v54 = vpop.eup %754 }
 0x270   :  { %v605_v55 = vmul.f32 %v755_v54, %v747_v44 }
 0x272   :  { %610 = vst [vmem:[#allocation8 + $0x10] sm:$0xff] %v605_v55 }
 0x273   :  { %v757_v56 = vpop.eup %756 }
 0x274   :  { %v607_v57 = vmul.f32 %v757_v56, %v749_v45 }
 0x276   :  { %611 = vst [vmem:[#allocation8 + $0x18] sm:$0xff] %v607_v57 }
 0x277   :  { %857 = shalt.err (!%p854_p8)
}
 0x278   :  { %s858_s10 = scalar_lea.hbm %s1035_s6, 512 }
 0x279   :  { %p859_p9 = scmp.ne.s32.totalorder %s1035_s6, %s858_s10  ;;  %p862_p10 = scmp.lt.u32.totalorder %s858_s10, %s1035_s6 }
 0x27b   :  { %p864_p11 = pnand %p862_p10, %p859_p9 }
 0x27d   :  { %867 = shalt.err (!%p864_p11)
}
 0x27e   :  { %s886_s0 = smov 128   ;;  %s887_s16 = smov 8  }
 0x27f   :  { %623 = dma.vmem_to_hbm [thread:$0]  %s618_s9, 512, %s1035_s6, [#allocation4], %s886_s0, %s886_s0, %s887_s16  }
 0x280   :  { %872 = dma.done.wait [#allocation4], 512  }
 0x281   :  { %873 = vsyncadd [#allocation4], 4294966784 }
 0x282   :  { %874 = dma.done.wait [#allocation10], 1536  }
 0x283   :  { %875 = vsyncadd [#allocation10], 4294965760 }
 0x284   :  { %642 = vsyncpa [#allocation3], 1 }
 0x285   :  { %643 = vsyncpa [#allocation6], 1 }
 0x286   :  { %644 = vsyncpa [#allocation4], 1 }
 0x287   :  { %645 = vsyncpa [#allocation10], 1 }

</bundles_post_ra>
